<compile_context>
chip_gen: v6e
topology: v6e:2x2x1
jax: 0.10.0
libtpu: 0.0.40
codegen_flags: <defaults>
</compile_context>

<pallas_src>
import functools

import jax
import jax.numpy as jnp
from jax.experimental import pallas as pl
from jax.experimental.pallas import tpu as pltpu

_NEG_BIG = -1.0e10  # same sentinel as the PyTorch module


def _patch_attention_kernel(x_ref, w_ref, b_ref, o_ref, scores_ref, *, n_patches):
    """One grid step = (batch row b, patch-chunk j).

    x_ref:      [1, TN, D]   VMEM block of x (streamed / double-buffered)
    w_ref:      [D, 128]     VMEM MXU RHS: col 0 = conv weight, col 1 = ones
    b_ref:      [1]          SMEM conv bias (scalar)
    o_ref:      [1, N, 1]    VMEM output block, resident across the chunk axis
    scores_ref: [n_pad, 1]   fp32 VMEM scratch holding this row's scores
    """
    j = pl.program_id(1)
    tn = x_ref.shape[1]
    n_pad = scores_ref.shape[0]

    x2d = x_ref[0]                       # [TN, D], native dtype (bf16 fed as-is)
    wmat = w_ref[...]                    # [D, 128]
    bias = b_ref[0]

    # Conv1d(1, 1, kernel_size=D) == per-patch dot product.  Both reductions run
    # on the MXU: col 0 of the first matmul is x . w, col 1 of the second is
    # sum(|x|) for the zero-patch mask.  No XLU lane reduce over D.
    raw = jnp.dot(x2d, wmat, preferred_element_type=jnp.float32)[:, 0:1]           # [TN, 1]
    sabs = jnp.dot(jnp.abs(x2d), wmat, preferred_element_type=jnp.float32)[:, 1:2]  # [TN, 1]
    score = jnp.where(sabs > 0.0, raw + bias, _NEG_BIG)       # mask trick as in PyTorch

    if n_pad != n_patches:
        # Last chunk may extend past N (padded block): drop those rows entirely.
        idx = j * tn + jax.lax.broadcasted_iota(jnp.int32, (tn, 1), 0)
        score = jnp.where(idx < n_patches, score, -jnp.inf)

    # Power-of-two alignment hint for the sublane-offset store.
    start = pl.multiple_of(j * tn, tn & -tn)
    scores_ref[pl.ds(start, tn), :] = score

    @pl.when(j == pl.num_programs(1) - 1)
    def _():
        s = scores_ref[...]                                   # [n_pad, 1]
        m = jnp.max(s, axis=0, keepdims=True)
        e = jnp.exp(s - m)
        denom = jnp.sum(e, axis=0, keepdims=True)
        weights = e / denom                                   # exact normalize (sums to 1)
        o_ref[...] = weights[:n_patches, :].reshape(o_ref.shape).astype(o_ref.dtype)


def _vmem_capacity_bytes():
    """Physical VMEM of the current generation; conservative fallback."""
    try:
        cap = int(pltpu.get_tpu_info().vmem_capacity_bytes)
        if cap > 0:
            return cap
    except Exception:
        pass
    return 64 * 1024 * 1024          # assume the smallest (v7x-sized) VMEM


def _choose_tile_n(n_patches, feature_dim, itemsize, per_buffer_budget):
    """Largest patch tile (multiple of 128 when tiling) whose x block fits the budget."""
    bytes_per_patch = max(1, feature_dim * itemsize)
    rows = per_buffer_budget // bytes_per_patch
    if rows >= n_patches:
        return n_patches                       # single chunk: block == full dim (always legal)
    tile = (rows // 128) * 128                 # lane-aligned, amortizes ~0.35us grid-step overhead
    if tile == 0:
        # Enormous D: fall back to the smallest legal (sublane-aligned) tile.
        # TODO(synk): chunk the D reduction in-kernel for feature_dim this large.
        tile = max(8, (rows // 8) * 8)
    return min(tile, n_patches)


def patch_attention(x, conv_w, conv_b, *, tile_n=None):
    """
    Args:
      x:      [B, N, D] float32 (or bfloat16) patch embeddings
      conv_w: Conv1d weight, [1, D] (raw [1, 1, D] also accepted)
      conv_b: Conv1d bias, [1]
    Returns:
      attention weights [B, N, 1] float32
    """
    B, N, D = x.shape
    w_vec = jnp.asarray(conv_w).reshape(D).astype(x.dtype)
    conv_b = jnp.asarray(conv_b).reshape(1).astype(jnp.float32)

    # MXU RHS: col 0 = conv weight (score), col 1 = ones (sum|x| for the mask).
    wmat = jnp.zeros((D, 128), dtype=x.dtype)
    wmat = wmat.at[:, 0].set(w_vec)
    wmat = wmat.at[:, 1].set(jnp.ones((D,), dtype=x.dtype))

    itemsize = jnp.dtype(x.dtype).itemsize
    vmem_cap = _vmem_capacity_bytes()
    per_buffer_budget = (16 * 1024 * 1024 if vmem_cap >= 96 * 1024 * 1024
                         else 8 * 1024 * 1024)

    if tile_n is not None:
        tn = min(int(tile_n), N)
    else:
        tn = _choose_tile_n(N, D, itemsize, per_buffer_budget)
    n_chunks = pl.cdiv(N, tn)
    if n_chunks > 1 and tn % 8 != 0:
        raise ValueError("tile_n must be a multiple of 8 when it tiles the patch axis")
    n_pad = n_chunks * tn

    # VMEM accounting: double-buffered x block, elementwise temporaries (|x| /
    # promotion, conservatively 2x the f32 block), MXU results, double-buffered
    # RHS, lane-padded scores scratch and (1, N, 1) output blocks, plus slack.
    x_block = tn * D * itemsize
    need = (2 * x_block
            + 2 * tn * D * 4
            + 4 * tn * 128 * 4
            + 2 * D * 128 * itemsize
            + n_pad * 128 * 4
            + 2 * N * 128 * 4
            + (2 << 20))
    vmem_limit = int(min(int(0.9 * vmem_cap), max(need, 16 * 1024 * 1024)))

    cost = pl.CostEstimate(
        flops=int(4 * B * N * D + 8 * B * N),
        transcendentals=int(B * N),
        bytes_accessed=int(B * N * D * itemsize + B * N * 4 + D * 128 * itemsize),
    )

    kernel = functools.partial(_patch_attention_kernel, n_patches=N)

    out = pl.pallas_call(
        kernel,
        out_shape=jax.ShapeDtypeStruct((B, N, 1), jnp.float32),
        grid=(B, n_chunks),
        in_specs=[
            pl.BlockSpec((1, tn, D), lambda b, j: (b, j, 0)),          # x, streamed blocks
            pl.BlockSpec((D, 128), lambda b, j: (0, 0)),               # MXU RHS (whole, reused)
            pl.BlockSpec(memory_space=pltpu.MemorySpace.SMEM),         # conv bias (scalar)
        ],
        out_specs=pl.BlockSpec((1, N, 1), lambda b, j: (b, 0, 0)),     # row output, resident over j
        scratch_shapes=[pltpu.VMEM((n_pad, 1), jnp.float32)],
        compiler_params=pltpu.CompilerParams(
            dimension_semantics=("parallel", "arbitrary"),
            vmem_limit_bytes=vmem_limit,
        ),
        cost_estimate=cost,
    )(x, wmat, conv_b)

    return out


def patch_attention_ref(x, conv_w, conv_b):
    """Pure-JAX reference mirroring the PyTorch forward (eval mode)."""
    w = jnp.asarray(conv_w).reshape(-1)
    scores = jnp.einsum("bnd,d->bn", x, w) + jnp.asarray(conv_b).reshape(())
    mask = (jnp.sum(jnp.abs(x), axis=2) > 0).astype(jnp.float32)
    scores = scores * mask - 1.0e10 * (1.0 - mask)
    return jax.nn.softmax(scores, axis=1)[..., None]


if __name__ == "__main__":
    def run_case(B, N, D, tile_n=None, zero_patch=None):
        key = jax.random.PRNGKey(0)
        kx, kw, kb = jax.random.split(key, 3)
        x = jax.random.normal(kx, (B, N, D), dtype=jnp.float32)
        if zero_patch is not None:
            bi, ni = zero_patch
            x = x.at[bi, ni, :].set(0.0)            # exercise the mask / -1e10 path
        bound = 1.0 / (D ** 0.5)
        conv_w = jax.random.uniform(kw, (1, D), jnp.float32, -bound, bound)
        conv_b = jax.random.uniform(kb, (1,), jnp.float32, -bound, bound)

        out = jax.block_until_ready(patch_attention(x, conv_w, conv_b, tile_n=tile_n))
        ref = patch_attention_ref(x, conv_w, conv_b)
        assert out.shape == (B, N, 1)
        assert jnp.allclose(out, ref, atol=3e-3, rtol=3e-3), "mismatch vs reference"
        assert jnp.allclose(jnp.sum(out[..., 0], axis=1), 1.0, atol=1e-3)
        return out

    # Small single-chunk case (block == full patch axis).
    out = run_case(2, 8, 32, zero_patch=(0, 3))
    assert float(out[0, 3, 0]) < 1e-6               # masked (all-zero) patch ~ zero weight

    # Tiled path: grid over the patch axis with a resident score scratch.
    run_case(2, 384, 128, tile_n=128, zero_patch=(1, 200))
    # Ragged tail: N not a multiple of tile_n (padded last block is masked out).
    run_case(2, 400, 128, tile_n=128, zero_patch=(0, 399))

    print("KERNEL_OK")
</pallas_src>

<mosaic_0001>
module attributes {stable_mosaic.version = 11 : i64} {
  func.func @_patch_attention_kernel(%arg0: i32, %arg1: i32, %arg2: memref<1x8x32xf32, #tpu.memory_space<vmem>>, %arg3: memref<32x128xf32, #tpu.memory_space<vmem>>, %arg4: memref<1xf32, #tpu.memory_space<smem>>, %arg5: memref<1x8x1xf32, #tpu.memory_space<vmem>>, %arg6: memref<8x1xf32, #tpu.memory_space<vmem>>) attributes {dimension_semantics = [#tpu.dimension_semantics<parallel>, #tpu.dimension_semantics<arbitrary>], iteration_bounds = array<i64: 2, 1>, scalar_prefetch = 0 : i64, scratch_operands = 1 : i64, tpu.core_type = #tpu.core_type<tc>, window_params = [{transform_indices = @transform_0, window_bounds = array<i64: 1, 8, 32>}, {pipeline_mode = #tpu.pipeline_mode<synchronous>, transform_indices = @transform_1, window_bounds = array<i64: 32, 128>}, {transform_indices = @transform_2, window_bounds = array<i64: 1>}, {transform_indices = @transform_3, window_bounds = array<i64: 1, 8, 1>}]} {
    %c0 = arith.constant 0 : index
    %c0_0 = arith.constant 0 : index
    %c0_1 = arith.constant 0 : index
    %0 = vector.load %arg2[%c0, %c0_0, %c0_1] : memref<1x8x32xf32, #tpu.memory_space<vmem>>, vector<1x8x32xf32>
    %1 = vector.shape_cast %0 : vector<1x8x32xf32> to vector<8x32xf32>
    %c0_2 = arith.constant 0 : index
    %c0_3 = arith.constant 0 : index
    %2 = vector.load %arg3[%c0_2, %c0_3] : memref<32x128xf32, #tpu.memory_space<vmem>>, vector<32x128xf32>
    %c0_4 = arith.constant 0 : index
    %3 = memref.load %arg4[%c0_4] : memref<1xf32, #tpu.memory_space<smem>>
    %cst = arith.constant dense<0.000000e+00> : vector<8x128xf32>
    %4 = tpu.matmul %1, %2, %cst {dimension_numbers = #tpu.dot_dimension_numbers<[1], [0], [0], [1], [0, 0, 1, 1], [], []>} : vector<8x32xf32>, vector<32x128xf32>, vector<8x128xf32> -> vector<8x128xf32>
    %5 = vector.extract_strided_slice %4 {offsets = [0, 0], sizes = [8, 1], strides = [1, 1]} : vector<8x128xf32> to vector<8x1xf32>
    %6 = math.absf %1 : vector<8x32xf32>
    %cst_5 = arith.constant dense<0.000000e+00> : vector<8x128xf32>
    %7 = tpu.matmul %6, %2, %cst_5 {dimension_numbers = #tpu.dot_dimension_numbers<[1], [0], [0], [1], [0, 0, 1, 1], [], []>} : vector<8x32xf32>, vector<32x128xf32>, vector<8x128xf32> -> vector<8x128xf32>
    %8 = vector.extract_strided_slice %7 {offsets = [0, 1], sizes = [8, 1], strides = [1, 1]} : vector<8x128xf32> to vector<8x1xf32>
    %cst_6 = arith.constant 0.000000e+00 : f32
    %9 = vector.broadcast %cst_6 : f32 to vector<8x1xf32>
    %10 = arith.cmpf ogt, %8, %9 : vector<8x1xf32>
    %11 = vector.broadcast %3 : f32 to vector<8x1xf32>
    %12 = arith.addf %5, %11 : vector<8x1xf32>
    %cst_7 = arith.constant -1.000000e+10 : f32
    %13 = vector.broadcast %cst_7 : f32 to vector<8x1xf32>
    %14 = arith.select %10, %12, %13 : vector<8x1xi1>, vector<8x1xf32>
    %c8_i32 = arith.constant 8 : i32
    %15 = arith.muli %arg1, %c8_i32 : i32
    %16 = tpu.assume_multiple %15, 8 : i32
    %17 = arith.index_cast %16 : i32 to index
    %c0_8 = arith.constant 0 : index
    %18 = vector.load %arg6[%17, %c0_8] : memref<8x1xf32, #tpu.memory_space<vmem>>, vector<8x1xf32>
    tpu.vector_store %arg6[%17, %c0_8], %14 {strides = array<i32>} : memref<8x1xf32, #tpu.memory_space<vmem>>, vector<8x1xf32>,
    %c0_i32 = arith.constant 0 : i32
    %19 = arith.cmpi eq, %arg1, %c0_i32 : i32
    %20 = arith.extui %19 : i1 to i32
    %c0_i32_9 = arith.constant 0 : i32
    %21 = arith.cmpi ne, %20, %c0_i32_9 : i32
    scf.if %21 {
      %c0_10 = arith.constant 0 : index
      %c0_11 = arith.constant 0 : index
      %22 = vector.load %arg6[%c0_10, %c0_11] : memref<8x1xf32, #tpu.memory_space<vmem>>, vector<8x1xf32>
      %cst_12 = arith.constant dense<0xFF800000> : vector<1xf32>
      %23 = vector.multi_reduction <maximumf>, %22, %cst_12 [0] : vector<8x1xf32> to vector<1xf32>
      %24 = vector.shape_cast %23 : vector<1xf32> to vector<1x1xf32>
      %25 = vector.broadcast %24 : vector<1x1xf32> to vector<8x1xf32>
      %26 = arith.subf %22, %25 : vector<8x1xf32>
      %27 = math.exp %26 : vector<8x1xf32>
      %cst_13 = arith.constant dense<0.000000e+00> : vector<1xf32>
      %28 = vector.multi_reduction <add>, %27, %cst_13 [0] : vector<8x1xf32> to vector<1xf32>
      %29 = vector.shape_cast %28 : vector<1xf32> to vector<1x1xf32>
      %30 = vector.broadcast %29 : vector<1x1xf32> to vector<8x1xf32>
      %31 = arith.divf %27, %30 : vector<8x1xf32>
      %32 = vector.shape_cast %31 : vector<8x1xf32> to vector<1x8x1xf32>
      %c0_14 = arith.constant 0 : index
      %c0_15 = arith.constant 0 : index
      %c0_16 = arith.constant 0 : index
      %33 = vector.load %arg5[%c0_14, %c0_15, %c0_16] : memref<1x8x1xf32, #tpu.memory_space<vmem>>, vector<1x8x1xf32>
      tpu.vector_store %arg5[%c0_14, %c0_15, %c0_16], %32 {strides = array<i32>} : memref<1x8x1xf32, #tpu.memory_space<vmem>>, vector<1x8x1xf32>,
    } else {
    }
    return
  }
  func.func @transform_0(%arg0: i32, %arg1: i32) -> (i32, i32, i32) {
    %c0_i32 = arith.constant 0 : i32
    %c0_i32_0 = arith.constant 0 : i32
    return %arg0, %arg1, %c0_i32 : i32, i32, i32
  }
  func.func @transform_1(%arg0: i32, %arg1: i32) -> (i32, i32) {
    %c0_i32 = arith.constant 0 : i32
    %c0_i32_0 = arith.constant 0 : i32
    %c0_i32_1 = arith.constant 0 : i32
    return %c0_i32, %c0_i32_0 : i32, i32
  }
  func.func @transform_2(%arg0: i32, %arg1: i32) -> i32 {
    %c0_i32 = arith.constant 0 : i32
    %c0_i32_0 = arith.constant 0 : i32
    return %c0_i32 : i32
  }
  func.func @transform_3(%arg0: i32, %arg1: i32) -> (i32, i32, i32) {
    %c0_i32 = arith.constant 0 : i32
    %c0_i32_0 = arith.constant 0 : i32
    %c0_i32_1 = arith.constant 0 : i32
    return %arg0, %c0_i32, %c0_i32_0 : i32, i32, i32
  }
}

</mosaic_0001>

<bundles_post_ra>
// kernel: tpu_custom_call.1
= control target key start
LH: loop header
LB: loop body
LE: loop exit
PB: predicated region body
PF: predicated region fallthrough
CT: control target
= control target key end

     0   :  { %s887_s0 = inlined_call_operand.hbm [shape: f32[2,8,32], index: 0, kind: input, shape index: {}]   ;;  %s888_s1 = inlined_call_operand.hbm [shape: f32[32,128], index: 1, kind: input, shape index: {}]   ;;  %s889_s2 = inlined_call_operand.<no memory space> [shape: f32[1], index: 2, kind: input, shape index: {}]   ;;  %s890_s3 = inlined_call_operand.vmem [shape: f32[2,8,1], index: 3, kind: output, shape index: {}]  }
   0x1   :  { %8 = sst [smem:[#allocation3]] %s889_s2 }
   0x2   :  { %9 = vsyncpa [#allocation5], 0 }
   0x3   :  { %11 = vsyncpa [#allocation5 + $0x1], 0 }
   0x4   :  { %12 = vsyncpa [#allocation7], 0  ;;  %s762_s14 = smov 0   ;;  %s764_s15 = smov 0  }
   0x5   :  { %s766_s16 = smov 0   ;;  %s768_s17 = smov 0  }
   0x6   :  { %s770_s18 = smov 0   ;;  %s772_s19 = smov 0  }
   0x7 LB: > { %s498_s2 = sadd.s32 4294967295, %s729_s19   ;;  %p52_p0 = scmp.ne.s32.totalorder %s713_s15, %s709_s14  ;;  %s729_s19 = sphi %s772_s19, %s18_s19   ;;  %s725_s18 = sphi %s770_s18, %s900_s18   ;;  %s721_s17 = sphi %s768_s17, %s899_s17   ;;  %s717_s16 = sphi %s766_s16, %s898_s16   ;;  %s713_s15 = sphi %s764_s15, %s897_s15   ;;  %s709_s14 = sphi %s762_s14, %s896_s14  }
   0x8   : > { %p792_p1 = scmp.eq.s32.totalorder %s498_s2, 0  ;;  %p500_p2 = scmp.ge.s32.totalorder %s729_s19, 1 }
   0x9   : > { %p131_p3 = scmp.lt.s32.totalorder %s729_s19, 3  ;;  %s731_s23 = smov [#allocation6]  }
   0xa   : > { %p800_p4 = por %p792_p1, %p52_p0  ;;  %s143_s24 = sshll.u32 %s731_s23, 4  ;;  %s144_s24 = int_to_ptr.vmem [resolvable:$true] %s143_s24 }
   0xb   : > { %p804_p5 = pnand %p500_p2, %p131_p3  ;;  %s30_s26 = sadd.s32 1, %s725_s18 }
   0xc   : > { %s632_s27 = scalar_lea.vmem %s144_s24, 512  ;;  %p640_p12 = scmp.lt.s32.totalorder %s144_s24, %s144_s24 }
   0xd   : > { %p551_p6 = pneg %p804_p5  ;;  %p633_p9 = scmp.ne.s32.totalorder %s144_s24, %s632_s27 }
   0xe   : > { %p641_p13 = scmp.lt.s32.totalorder %s632_s27, %s632_s27 }
   0xf   : > { %p812_p7 = pnand %p551_p6, %p792_p1 }
  0x10   : > { %p642_p0 = por %p641_p13, %p640_p12 }
  0x11   : > { %p623_p8 = pneg %p812_p7 }
  0x13   : > { %p635_p10 = pnand %p633_p9, %p623_p8 }
  0x15   : > { %p636_p11 = pneg %p635_p10 }
  0x17   : > { %p643_p2 = pnand %p642_p0, %p636_p11 }
  0x19   : > { %646 = shalt.err (!%p643_p2)
}
  0x1a   : > { %s732_s28 = smov 128   ;;  %s733_s29 = smov 8  }
  0x1b   : > { %554 = dma.hbm_to_vmem [thread:$0]  (!%p812_p7), %s888_s1, 512, %s144_s24, [#allocation7], %s732_s28, %s732_s28, %s733_s29  }
  0x1c   : > { %p32_p3 = scmp.ge.s32.totalorder %s30_s26, 2  ;;  %s39_s5 = sadd.s32 1, %s717_s16 }
  0x1d   : > { %p46_p6 = scmp.ne.s32.totalorder %s717_s16, %s713_s15  ;;  %p47_p8 = scmp.eq.s32.totalorder %s729_s19, 0 }
  0x1e   : > { %s902_s26 = smov (%p32_p3, %s30_s26), 0  ;;  %p560_p10 = scmp.lt.s32.totalorder %s729_s19, 2 }
  0x1f   : > { %p48_p9 = por %p47_p8, %p46_p6  ;;  %s34_s6 = ssub.s32 %s725_s18, %s902_s26 }
  0x20   : > { %s160_s7 = sand.u32 1, %s717_s16   ;;  %p37_p11 = scmp.eq.s32.totalorder %s34_s6, 0 }
  0x21   : > { %s503_s8 = sshll.u32 %s160_s7, 3  ;;  %s504_s9 = sshll.u32 %s725_s18, 7 }
  0x22   : > { %s836_s10 = scalar_select %p37_p11, %s717_s16, %s39_s5  }
  0x23   : > { %s170_s13 = scalar_lea.hbm %s887_s0, %s504_s9  ;;  %s164_s14 = scalar_lea.vmem [#allocation4], %s503_s8 }
  0x24   : > { %s172_s2 = sshll.u32 %s164_s14, 4  ;;  %p841_p7 = pnand %p560_p10, %p48_p9  ;;  %s173_s2 = int_to_ptr.vmem [resolvable:$true] %s172_s2 }
  0x25   : > { %s161_s24 = scalar_lea.sflag [#allocation5], %s160_s7  ;;  %s660_s25 = scalar_lea.vmem %s173_s2, 128 }
  0x26   : > { %p649_p12 = pneg %p841_p7  ;;  %p661_p13 = scmp.ne.s32.totalorder %s173_s2, %s660_s25 }
  0x27   : > { %s734_s27 = smov [#allocation4]  }
  0x28   : > { %p663_p0 = pnand %p661_p13, %p649_p12  ;;  %s665_s28 = sshll.u32 %s734_s27, 4  ;;  %s666_s28 = int_to_ptr.vmem [resolvable:$false] %s665_s28 }
  0x29   : > { %s667_s29 = scalar_lea.vmem %s666_s28, 256  ;;  %p668_p3 = scmp.lt.s32.totalorder %s173_s2, %s666_s28 }
  0x2a   : > { %p664_p2 = pneg %p663_p0  ;;  %p669_p6 = scmp.lt.s32.totalorder %s667_s29, %s660_s25 }
  0x2c   : > { %p670_p8 = por %p669_p6, %p668_p3 }
  0x2e   : > { %p671_p9 = pnand %p670_p8, %p664_p2 }
  0x30   : > { %674 = shalt.err (!%p671_p9)
}
  0x31   : > { %558 = dma.hbm_to_vmem [thread:$0]  (!%p841_p7), %s170_s13, 128, %s173_s2, %s161_s24  }
  0x32   : > { %181 = sbr.rel (%p804_p5) target bundleno = 563 (0x233), region = 32  ;;  %s183_s30 = sand.u32 (!%p804_p5), 1, %s713_s15  }
  0x33   : > { %s506_s4 = sshll.u32 (!%p804_p5), %s183_s30, 3  ;;  %s184_s5 = scalar_lea.sflag (!%p804_p5), [#allocation5], %s183_s30 }
  0x34   : > { %s187_s6 = scalar_lea.vmem (!%p804_p5), [#allocation4], %s506_s4 }
  0x37   : > { %700 = dma.done.wait (%p800_p4), %s184_s5, 128  }
  0x38   : > { %702 = vsyncadd (%p800_p4), %s184_s5, 4294967168 }
  0x39   : > { %704 = dma.done.wait (%p792_p1), [#allocation7], 512  }
  0x3a   : > { %706 = vsyncadd (%p792_p1), [#allocation7], 4294966784  ;;  %v735_v0 = vmov 0.0   ;;  %vm736_vm0 = vmmov 0   ;;  %v221_v1 = vld [vmem:[#allocation6 + $0x18] sm:$0xff]  ;;  %v220_v2 = vld [vmem:[#allocation6 + $0x10] sm:$0xff] }
  0x3b   : > { %523 = vmatprep.subr.mxu0 %v735_v0  ;;  %531 = vmatprep.mubr.msk.f32.mxu0 %vm736_vm0, %v735_v0  ;;  %v219_v3 = vld [vmem:[#allocation6 + $0x8] sm:$0xff]  ;;  %v217_v4 = vld [vmem:[%s187_s6] sm:$0xff]  ;;  %v218_v5 = vld [vmem:[#allocation6] sm:$0xff]  ;;  %vm223_vm1 = vcmask 261120   ;;  %s222_s20 = sld [smem:[#allocation3]]  ;;  %s737_s21 = smov 1  }
  0x3c   : > { %534 = vmatprep.subr.mxu1 %v735_v0  ;;  %542 = vmatprep.mubr.msk.f32.mxu1 %vm736_vm0, %v735_v0  ;;  %v297_v6 = vand.u32 2147483647, %v217_v4  ;;  %s738_s22 = smov 127   ;;  %vm385_vm3 = vcmask 7168   ;;  %p213_p1 = scmp.lt.s32.totalorder %s721_s17, 1 }
  0x3d   : > { %524 = vmatpush3.msra.mxu0 %v221_v1  ;;  %535 = vmatpush3.msra.mxu1 %v221_v1 }
  0x3e   : > { %525 = vmatprep.subr.mxu0 %v735_v0  ;;  %536 = vmatprep.subr.mxu1 %v735_v0  ;;  %s904_s17 = smov (!%p213_p1, %s721_s17), 1 }
  0x3f   : > { %526 = vmatpush3.msra.mxu0 %v220_v2  ;;  %537 = vmatpush3.msra.mxu1 %v220_v2  ;;  %s508_s7 = sshll.u32 %s904_s17, 3 }
  0x40   : > { %527 = vmatprep.subr.mxu0 %v735_v0  ;;  %538 = vmatprep.subr.mxu1 %v735_v0  ;;  %s216_s11 = scalar_lea.vmem %s890_s3, %s508_s7 }
  0x41   : > { %528 = vmatpush3.msra.mxu0 %v219_v3  ;;  %539 = vmatpush3.msra.mxu1 %v219_v3  ;;  %v372_v7 = vstv %s222_s20 }
  0x42   : > { %529 = vmatprep.subr.mxu0 %v735_v0  ;;  %540 = vmatprep.subr.mxu1 %v735_v0 }
  0x43   : > { %530 = vmatpush3.msra.mxu0 %v218_v5  ;;  %541 = vmatpush3.msra.mxu1 %v218_v5 }
  0x44   : > { %532 = vmatmul.mubr.msk.f32.vlgmr.msra.gmra.mxu0 %vm223_vm1, %v217_v4  ;;  %543 = vmatmul.mubr.msk.f32.vlgmr.msra.gmra.mxu1 %vm223_vm1, %v297_v6 }
 0x104   : > { %v293_v8 = vpop.f32.mrf.mxu0  ;;  %v367_v9 = vpop.f32.mrf.mxu1 }
 0x105   : > { %v373_v10 = vadd.f32 %v372_v7, %v293_v8  ;;  %vm371_vm2 = vcmp.gt.f32.partialorder %v367_v9, 0.0 }
 0x106   : > { %v533_v11 = vpop.f32.mrf.mxu0  ;;  %v544_v12 = vpop.f32.mrf.mxu1 }
 0x107   : > { %375 = vrot.lane.b32.xlu0 %v373_v10, %s737_s21 }
 0x179   : > { %v376_v13 = vpop.permute.xlu0 %375 }
 0x17a   : > { %v378_v14 = vsel %vm371_vm2, %v376_v13, -1e+10 }
 0x17b   : > { %381 = vrot.lane.b32.xlu0 %v378_v14, %s738_s22 }
 0x1ed   : > { %v382_v15 = vpop.permute.xlu0 %381 }
 0x1ee   : > { %386 = vst.msk [vmem:[#allocation2] sm:$0xff] %vm385_vm3, %v382_v15 }
 0x1f5   : > { %v391_v16 = vld [vmem:[#allocation2] sm:$0xff] }
 0x1f6   : > { %v392_v17 = vsel %vm385_vm3, %v391_v16, -inf }
 0x1f7   : > { %v393_v18 = vrot.slane %v392_v17, 4 }
 0x1f9   : > { %v394_v19 = vmax.f32 %v392_v17, %v393_v18 }
 0x1fb   : > { %v395_v20 = vrot.slane %v394_v19, 2 }
 0x1fd   : > { %v396_v21 = vmax.f32 %v394_v19, %v395_v20 }
 0x1ff   : > { %v397_v22 = vrot.slane %v396_v21, 1 }
 0x201   : > { %v398_v23 = vmax.f32 %v396_v21, %v397_v22 }
 0x203   : > { %v399_v24 = vsub.f32 %v391_v16, %v398_v23 }
 0x205   : > { %v400_v25 = vmul.f32 1.442695, %v399_v24 }
 0x207   : > { %617 = vpow2.f32 %v400_v25 }
 0x214   : > { %v618_v26 = vpop.eup %617 }
 0x215   : > { %v402_v27 = vsel %vm385_vm3, %v618_v26, 0.0 }
 0x216   : > { %v403_v28 = vrot.slane %v402_v27, 4 }
 0x218   : > { %v404_v29 = vadd.f32 %v403_v28, %v402_v27 }
 0x21a   : > { %v405_v30 = vrot.slane %v404_v29, 2 }
 0x21c   : > { %v406_v31 = vadd.f32 %v405_v30, %v404_v29 }
 0x21e   : > { %v407_v32 = vrot.slane %v406_v31, 1 }
 0x220   : > { %v408_v33 = vadd.f32 %v407_v32, %v406_v31 }
 0x222   : > { %619 = vrcp.f32 %v408_v33 }
 0x22f   : > { %v620_v34 = vpop.eup %619 }
 0x230   : > { %v410_v35 = vmul.f32 %v620_v34, %v618_v26 }
 0x232   : > { %411 = vst.msk [vmem:[%s216_s11] sm:$0xff] %vm385_vm3, %v410_v35 }
 0x233 PF: > { %s18_s19 = sadd.s32 1, %s729_s19   ;;  %s896_s14 = smov %s713_s15 }
 0x234   : > { %p15_p4 = scmp.ge.s32.totalorder %s18_s19, 4   ;;  %s897_s15 = smov %s717_s16 }
 0x235   : > { %s898_s16 = smov %s836_s10  ;;  %s899_s17 = smov %s725_s18 }
 0x236   : > { %s900_s18 = smov %s902_s26  ;;  %17 = sbr.rel (!%p15_p4) target bundleno = 7 (0x7), region = 81 }
 0x23b   :  { %431 = vsyncpa [#allocation5], 1 }
 0x23c   :  { %433 = vsyncpa [#allocation5 + $0x1], 1 }
 0x23d   :  { %434 = vsyncpa [#allocation7], 1 }

</bundles_post_ra>
